<compile_context>
chip_gen: v7x
topology: tpu7x:2x2x1
jax: 0.10.0
libtpu: 0.0.40
codegen_flags: <defaults>
</compile_context>

<pallas_src>
import jax
import jax.numpy as jnp
from jax import lax
from jax.experimental import pallas as pl
from jax.experimental.pallas import tpu as pltpu

LANES = 128                              # lane-dense inner dim of the slab
_TARGET_TILE_BYTES = 8 * 1024 * 1024     # ~8 MiB per input tile
_CHUNK_ROWS = 512                        # rows per inner accumulation chunk
_MAX_VMEM_LIMIT = 48 * 1024 * 1024       # stays under v7x's 64 MiB / TC


def _sublane_align(dtype) -> int:
    # native tiles: (8,128) f32 / (16,128) bf16 / (32,128) int8-fp8
    return max(8, 32 // jnp.dtype(dtype).itemsize)


def _num_tensorcores() -> int:
    """Best-effort TensorCores-per-device (megacore v4/v5p/v7x -> 2, else 1)."""
    try:
        dev = jax.devices()[0]
        if dev.platform != "tpu":
            return 1
        kind = str(getattr(dev, "device_kind", "")).lower()
        if any(tok in kind for tok in ("v7", "v5p", "v4")):
            return 2
    except Exception:
        pass
    return 1


def _split_flat(flat, align):
    """Aligned [M,128] prefix slab (pure reshape, NO pad/copy of the bulk) + tiny tail."""
    chunk = align * LANES
    n = flat.shape[0]
    n_main = (n // chunk) * chunk
    main = flat[:n_main].reshape(-1, LANES) if n_main else None
    tail = flat[n_main:] if n_main < n else None
    return main, tail


def _pick_block_rows(m_rows, max_itemsize):
    """Largest row-block <= ~8 MiB per input tile (multiple of the chunk size)."""
    target = _TARGET_TILE_BYTES // (LANES * max_itemsize)
    target = max(_CHUNK_ROWS, (target // _CHUNK_ROWS) * _CHUNK_ROWS)
    return min(m_rows, target)


def _pick_chunk(block_rows):
    for c in (_CHUNK_ROWS, 256, 128, 64, 32, 16, 8):
        if block_rows % c == 0:
            return c
    return block_rows


def _make_kernel(*, m_rows, block_rows, blocks_total, nsplit, chunk, acc_rows):
    n_chunks = block_rows // chunk
    groups = chunk // acc_rows
    ragged = (m_rows % block_rows) != 0
    blocks_per_core = pl.cdiv(blocks_total, nsplit)
    overhang = nsplit * blocks_per_core != blocks_total     # odd split -> 1 dummy step
    step_axis = 1 if nsplit > 1 else 0
    unroll = min(4, n_chunks)

    def kernel(x_ref, t_ref, out_ref, acc_ref):
        step = pl.program_id(step_axis)

        @pl.when(step == 0)
        def _():
            acc_ref[...] = jnp.zeros_like(acc_ref)

        if nsplit > 1:
            blk = step * nsplit + pl.program_id(0)           # interleaved block owner
        else:
            blk = step                                       # contiguous walk (1-TC chips)

        def accumulate(masked):
            # Chunked, vreg-resident accumulation: never materializes a
            # (block_rows,128) temporary; adds directly into the striped acc.
            def body(r, carry):
                off = pl.multiple_of(r * chunk, chunk)
                xa = x_ref[pl.ds(off, chunk), :].astype(jnp.float32)
                ta = t_ref[pl.ds(off, chunk), :].astype(jnp.float32)
                d = xa - ta
                if masked:
                    # Partial last block: out-of-bounds rows hold unspecified
                    # data; select them to 0 BEFORE squaring (NaN/Inf safe).
                    rows = (lax.broadcasted_iota(jnp.int32, (chunk, LANES), 0)
                            + blk * block_rows + off)
                    d = jnp.where(rows < m_rows, d, 0.0)
                acc_ref[...] += (d * d).reshape(groups, acc_rows, LANES).sum(axis=0)
                return carry

            lax.fori_loop(0, n_chunks, body, 0, unroll=unroll)

        if ragged:
            # Mask only on the last global block; full blocks stay mask-free.
            @pl.when(blk < blocks_total - 1)
            def _():
                accumulate(False)

            @pl.when(blk == blocks_total - 1)
            def _():
                accumulate(True)
            # blk >= blocks_total (odd-split overhang): skip entirely.
        elif overhang:
            @pl.when(blk < blocks_total)
            def _():
                accumulate(False)
        else:
            accumulate(False)

        @pl.when(step == pl.num_programs(step_axis) - 1)
        def _():
            # single cross-lane/sublane reduce per core, scalar -> SMEM output
            out_ref[0, 0] = jnp.sum(acc_ref[...])

    return kernel


def _pallas_sq_diff_sum(x2d, t2d, block_rows=None, nsplit=None):
    """Sum of squared differences over [M, 128] slabs (Pallas reduction)."""
    m_rows, lanes = x2d.shape
    assert lanes == LANES and t2d.shape == x2d.shape
    assert m_rows % 8 == 0, "slab rows must be sublane aligned"

    x_item = jnp.dtype(x2d.dtype).itemsize
    t_item = jnp.dtype(t2d.dtype).itemsize
    if block_rows is None:
        block_rows = _pick_block_rows(m_rows, max(x_item, t_item))
    block_rows = min(block_rows, m_rows)
    blocks_total = pl.cdiv(m_rows, block_rows)

    # Split the reduction across TensorCores only on multi-TC chips; keep a
    # contiguous 1-D grid on 1-TC chips.  Odd block counts still split (uneven
    # interleave + in-kernel skip) instead of collapsing onto one core.
    if nsplit is None:
        nsplit = _num_tensorcores()
    nsplit = 2 if (nsplit >= 2 and blocks_total >= 2) else 1
    blocks_per_core = pl.cdiv(blocks_total, nsplit)
    overhang = nsplit * blocks_per_core != blocks_total

    chunk = _pick_chunk(block_rows)
    acc_rows = 32 if chunk % 32 == 0 else 8                  # striped accumulator

    # live VMEM = 2 inputs x 2 pipeline buffers x tile  (+ acc + headroom)
    tile_bytes = block_rows * LANES * (x_item + t_item)
    vmem_limit = int(min(max(2 * tile_bytes + (4 << 20), 16 << 20), _MAX_VMEM_LIMIT))

    kern = _make_kernel(m_rows=m_rows, block_rows=block_rows,
                        blocks_total=blocks_total, nsplit=nsplit,
                        chunk=chunk, acc_rows=acc_rows)

    cost = pl.CostEstimate(flops=3 * x2d.size, transcendentals=0,
                           bytes_accessed=x2d.nbytes + t2d.nbytes + 4 * nsplit)

    if nsplit == 1:
        grid = (blocks_total,)
        in_map = lambda i: (i, 0)
        out_map = lambda i: (0, 0)
        semantics = ("arbitrary",)
    else:
        grid = (nsplit, blocks_per_core)
        last = blocks_total - 1
        if overhang:
            # keep the dummy overhang step's DMA in-bounds; compute is skipped
            in_map = lambda c, i: (jnp.minimum(i * nsplit + c, last), 0)
        else:
            in_map = lambda c, i: (i * nsplit + c, 0)
        out_map = lambda c, i: (c, 0)
        semantics = ("parallel", "arbitrary")

    partials = pl.pallas_call(
        kern,
        out_shape=jax.ShapeDtypeStruct((nsplit, 1), jnp.float32),
        grid_spec=pltpu.PrefetchScalarGridSpec(
            num_scalar_prefetch=0,
            grid=grid,
            in_specs=[
                pl.BlockSpec((block_rows, LANES), in_map),
                pl.BlockSpec((block_rows, LANES), in_map),
            ],
            out_specs=pl.BlockSpec((1, 1), out_map,
                                   memory_space=pltpu.MemorySpace.SMEM),
            # VMEM scratch is physically per-TensorCore, so each core owns a
            # private accumulator under the "parallel" axis (no race).
            scratch_shapes=[pltpu.VMEM((acc_rows, LANES), jnp.float32)],
        ),
        compiler_params=pltpu.CompilerParams(
            dimension_semantics=semantics,
            vmem_limit_bytes=vmem_limit,
        ),
        cost_estimate=cost,
    )(x2d, t2d)
    return jnp.sum(partials)


# --- custom VJP: d(sum((x-t)^2))/dx = 2*(x-t); cheap elementwise backward ----
@jax.custom_vjp
def _sq_diff_sum(x2d, t2d):
    return _pallas_sq_diff_sum(x2d, t2d)


def _sq_diff_sum_fwd(x2d, t2d):
    return _pallas_sq_diff_sum(x2d, t2d), (x2d, t2d)


def _sq_diff_sum_bwd(res, g):
    x2d, t2d = res
    d = x2d.astype(jnp.float32) - t2d.astype(jnp.float32)
    gx = (2.0 * g) * d
    return gx.astype(x2d.dtype), (-gx).astype(t2d.dtype)


_sq_diff_sum.defvjp(_sq_diff_sum_fwd, _sq_diff_sum_bwd)


class ContentLoss:
    """JAX/Pallas port of the PyTorch ContentLoss module."""

    def __init__(self, target):
        self.target = jax.lax.stop_gradient(target)          # "detach"
        self._t_flat = self.target.reshape(-1)
        self._t_align = _sublane_align(self.target.dtype)
        self._t_split_cache = {}                              # align -> (main, tail)
        self.loss = None

    def _target_split(self, align):
        if align not in self._t_split_cache:
            self._t_split_cache[align] = _split_flat(self._t_flat, align)
        return self._t_split_cache[align]

    def __call__(self, x):
        assert x.shape == self.target.shape, "input/target shape mismatch"
        n_elem = x.size

        align = max(_sublane_align(x.dtype), self._t_align)
        x_main, x_tail = _split_flat(x.reshape(-1), align)    # pure reshape, no pad
        t_main, t_tail = self._target_split(align)

        sq_sum = jnp.float32(0.0)
        if x_main is not None:
            sq_sum = sq_sum + _sq_diff_sum(x_main, t_main)    # Pallas HBM-stream reduce
        if x_tail is not None:
            dt = x_tail.astype(jnp.float32) - t_tail.astype(jnp.float32)
            sq_sum = sq_sum + jnp.sum(dt * dt)                # tiny (< align*128) tail

        self.loss = sq_sum / jnp.float32(n_elem)              # F.mse_loss 'mean'
        return x                                              # identity pass-through


if __name__ == "__main__":
    key = jax.random.PRNGKey(0)
    k1, k2, k3, k4, k5, k6 = jax.random.split(key, 6)

    # Small conv-feature-map-like shape: NCHW
    B, C, H, W = 2, 4, 16, 16
    x = jax.random.normal(k1, (B, C, H, W), dtype=jnp.float32)
    target = jax.random.normal(k2, (B, C, H, W), dtype=jnp.float32)

    mod = ContentLoss(target)
    out = jax.block_until_ready(mod(x))
    loss = jax.block_until_ready(mod.loss)

    ref = jnp.mean((x - target) ** 2)
    assert jnp.allclose(loss, ref, rtol=1e-6, atol=1e-6), (loss, ref)
    assert jnp.array_equal(out, x)

    # Unaligned element count -> aligned-prefix + plain-JAX tail path (no pad copy).
    x_odd = jax.random.normal(k3, (2, 3, 5, 7), dtype=jnp.float32)
    t_odd = jax.random.normal(k4, (2, 3, 5, 7), dtype=jnp.float32)
    mod_odd = ContentLoss(t_odd)
    _ = jax.block_until_ready(mod_odd(x_odd))
    loss_odd = jax.block_until_ready(mod_odd.loss)
    ref_odd = jnp.mean((x_odd - t_odd) ** 2)
    assert jnp.allclose(loss_odd, ref_odd, rtol=1e-6, atol=1e-6), (loss_odd, ref_odd)

    # Ragged last block + forced 2-way split, even block count (56 rows / 16-row blocks).
    xs = jax.random.normal(k5, (56, LANES), dtype=jnp.float32)
    ts = jax.random.normal(k6, (56, LANES), dtype=jnp.float32)
    s = jax.block_until_ready(_pallas_sq_diff_sum(xs, ts, block_rows=16, nsplit=2))
    s_ref = jnp.sum((xs - ts) ** 2)
    assert jnp.allclose(s, s_ref, rtol=1e-6, atol=1e-4), (s, s_ref)

    # Odd block count + forced 2-way split (exercises the overhang clamp/skip path).
    s2 = jax.block_until_ready(
        _pallas_sq_diff_sum(xs[:40], ts[:40], block_rows=16, nsplit=2))
    s2_ref = jnp.sum((xs[:40] - ts[:40]) ** 2)
    assert jnp.allclose(s2, s2_ref, rtol=1e-6, atol=1e-4), (s2, s2_ref)

    # Gradient path via the custom VJP: d(loss)/dx = 2*(x - target)/N
    def loss_fn(xx):
        m = ContentLoss(target)
        m(xx)
        return m.loss

    g = jax.block_until_ready(jax.grad(loss_fn)(x))
    g_ref = 2.0 * (x - target) / x.size
    assert jnp.allclose(g, g_ref, rtol=1e-5, atol=1e-6), "grad mismatch"

    print("KERNEL_OK")
</pallas_src>

<mosaic_0001>
module attributes {stable_mosaic.version = 11 : i64} {
  func.func @kernel(%arg0: i32, %arg1: memref<16x128xf32, #tpu.memory_space<vmem>>, %arg2: memref<16x128xf32, #tpu.memory_space<vmem>>, %arg3: memref<1x1xf32, #tpu.memory_space<smem>>, %arg4: memref<8x128xf32, #tpu.memory_space<vmem>>) attributes {dimension_semantics = [#tpu.dimension_semantics<arbitrary>], iteration_bounds = array<i64: 1>, scalar_prefetch = 0 : i64, scratch_operands = 1 : i64, tpu.core_type = #tpu.core_type<tc>, window_params = [{transform_indices = @transform_0, window_bounds = array<i64: 16, 128>}, {transform_indices = @transform_1, window_bounds = array<i64: 16, 128>}, {transform_indices = @transform_2, window_bounds = array<i64: 1, 1>}]} {
    %c0_i32 = arith.constant 0 : i32
    %0 = arith.cmpi eq, %arg0, %c0_i32 : i32
    %1 = arith.extui %0 : i1 to i32
    %c0_i32_0 = arith.constant 0 : i32
    %2 = arith.cmpi ne, %1, %c0_i32_0 : i32
    scf.if %2 {
      %cst_9 = arith.constant 0.000000e+00 : f32
      %19 = vector.broadcast %cst_9 : f32 to vector<8x128xf32>
      %c0_10 = arith.constant 0 : index
      %c0_11 = arith.constant 0 : index
      %20 = vector.load %arg4[%c0_10, %c0_11] : memref<8x128xf32, #tpu.memory_space<vmem>>, vector<8x128xf32>
      tpu.vector_store %arg4[%c0_10, %c0_11], %19 {strides = array<i32>} : memref<8x128xf32, #tpu.memory_space<vmem>>, vector<8x128xf32>,
    } else {
    }
    %c0_i32_1 = arith.constant 0 : i32
    %c16_i32 = arith.constant 16 : i32
    %3 = arith.muli %c0_i32_1, %c16_i32 : i32
    %4 = tpu.assume_multiple %3, 16 : i32
    %5 = arith.index_cast %4 : i32 to index
    %c0 = arith.constant 0 : index
    %6 = vector.load %arg1[%5, %c0] : memref<16x128xf32, #tpu.memory_space<vmem>>, vector<16x128xf32>
    %7 = arith.index_cast %4 : i32 to index
    %c0_2 = arith.constant 0 : index
    %8 = vector.load %arg2[%7, %c0_2] : memref<16x128xf32, #tpu.memory_space<vmem>>, vector<16x128xf32>
    %9 = arith.subf %6, %8 : vector<16x128xf32>
    %c0_3 = arith.constant 0 : index
    %c0_4 = arith.constant 0 : index
    %10 = vector.load %arg4[%c0_3, %c0_4] : memref<8x128xf32, #tpu.memory_space<vmem>>, vector<8x128xf32>
    %11 = arith.mulf %9, %9 : vector<16x128xf32>
    %12 = vector.shape_cast %11 : vector<16x128xf32> to vector<2x8x128xf32>
    %cst = arith.constant dense<0.000000e+00> : vector<8x128xf32>
    %13 = vector.multi_reduction <add>, %12, %cst [0] : vector<2x8x128xf32> to vector<8x128xf32>
    %14 = arith.addf %10, %13 : vector<8x128xf32>
    %c0_5 = arith.constant 0 : index
    %c0_6 = arith.constant 0 : index
    %15 = vector.load %arg4[%c0_5, %c0_6] : memref<8x128xf32, #tpu.memory_space<vmem>>, vector<8x128xf32>
    tpu.vector_store %arg4[%c0_5, %c0_6], %14 {strides = array<i32>} : memref<8x128xf32, #tpu.memory_space<vmem>>, vector<8x128xf32>,
    %c1_i32 = arith.constant 1 : i32
    %c0_i32_7 = arith.constant 0 : i32
    %16 = arith.cmpi eq, %arg0, %c0_i32_7 : i32
    %17 = arith.extui %16 : i1 to i32
    %c0_i32_8 = arith.constant 0 : i32
    %18 = arith.cmpi ne, %17, %c0_i32_8 : i32
    scf.if %18 {
      %c0_9 = arith.constant 0 : index
      %c0_10 = arith.constant 0 : index
      %19 = vector.load %arg4[%c0_9, %c0_10] : memref<8x128xf32, #tpu.memory_space<vmem>>, vector<8x128xf32>
      %20 = vector.shape_cast %19 : vector<8x128xf32> to vector<1x8x128xf32>
      %cst_11 = arith.constant dense<0.000000e+00> : vector<1xf32>
      %21 = vector.multi_reduction <add>, %20, %cst_11 [1, 2] : vector<1x8x128xf32> to vector<1xf32>
      %22 = vector.shape_cast %21 : vector<1xf32> to vector<1x1x1xf32>
      %23 = vector.extract %22[0, 0, 0] : f32 from vector<1x1x1xf32>
      %c0_12 = arith.constant 0 : index
      %c0_13 = arith.constant 0 : index
      %24 = memref.load %arg3[%c0_12, %c0_13] : memref<1x1xf32, #tpu.memory_space<smem>>
      memref.store %23, %arg3[%c0_12, %c0_13] : memref<1x1xf32, #tpu.memory_space<smem>>
    } else {
    }
    return
  }
  func.func @transform_0(%arg0: i32) -> (i32, i32) {
    %c0_i32 = arith.constant 0 : i32
    %c0_i32_0 = arith.constant 0 : i32
    return %arg0, %c0_i32 : i32, i32
  }
  func.func @transform_1(%arg0: i32) -> (i32, i32) {
    %c0_i32 = arith.constant 0 : i32
    %c0_i32_0 = arith.constant 0 : i32
    return %arg0, %c0_i32 : i32, i32
  }
  func.func @transform_2(%arg0: i32) -> (i32, i32) {
    %c0_i32 = arith.constant 0 : i32
    %c0_i32_0 = arith.constant 0 : i32
    %c0_i32_1 = arith.constant 0 : i32
    return %c0_i32, %c0_i32_0 : i32, i32
  }
}

</mosaic_0001>

<bundles_post_ra>
// kernel: tpu_custom_call.1
= control target key start
LH: loop header
LB: loop body
LE: loop exit
PB: predicated region body
PF: predicated region fallthrough
CT: control target
= control target key end

     0   :  { %7 = vsyncpa [#allocation4], 0  ;;  %s210_s0 = inlined_call_operand.hbm [shape: f32[16,128], index: 0, kind: input, shape index: {}]   ;;  %s211_s1 = inlined_call_operand.hbm [shape: f32[16,128], index: 1, kind: input, shape index: {}]   ;;  %s212_s2 = inlined_call_operand.hbm [shape: f32[1,1], index: 2, kind: output, shape index: {}]  }
   0x1   :  { %8 = vsyncpa [#allocation7], 0 }
   0x2   :  { %9 = vsyncpa [#allocation5], 0  ;;  %s154_s9 = smov [#allocation3]   ;;  %s94_s13 = scalar_lea.hbm %s210_s0, 256 }
   0x3   :  { %s15_s10 = sshll.u32 %s154_s9, 4  ;;  %p95_p0 = scmp.ne.s32.totalorder %s210_s0, %s94_s13  ;;  %s16_s10 = int_to_ptr.vmem [resolvable:$true] %s15_s10 }
   0x4   :  { %p98_p1 = scmp.lt.u32.totalorder %s94_s13, %s210_s0 }
   0x6   :  { %p100_p2 = pnand %p98_p1, %p95_p0 }
   0x8   :  { %103 = shalt.err (!%p100_p2)
}
   0x9   :  { %s104_s18 = scalar_lea.vmem %s16_s10, 256  ;;  %p109_p4 = scmp.lt.s32.totalorder %s16_s10, %s16_s10 }
   0xa   :  { %p105_p3 = scmp.ne.s32.totalorder %s16_s10, %s104_s18  ;;  %p110_p5 = scmp.lt.s32.totalorder %s104_s18, %s104_s18 }
   0xc   :  { %p111_p6 = por %p110_p5, %p109_p4 }
   0xe   :  { %p112_p7 = pnand %p111_p6, %p105_p3 }
  0x10   :  { %115 = shalt.err (!%p112_p7)
}
  0x11   :  { %s155_s19 = smov 128   ;;  %s156_s20 = smov 8  }
  0x12   :  { %21 = dma.hbm_to_vmem [thread:$0]  %s210_s0, 256, %s16_s10, [#allocation4], %s155_s19, %s155_s19, %s156_s20  }
  0x13   :  { %s157_s23 = smov [#allocation6]   ;;  %s116_s27 = scalar_lea.hbm %s211_s1, 256 }
  0x14   :  { %s27_s24 = sshll.u32 %s157_s23, 4  ;;  %p117_p8 = scmp.ne.s32.totalorder %s211_s1, %s116_s27  ;;  %s28_s24 = int_to_ptr.vmem [resolvable:$true] %s27_s24 }
  0x15   :  { %p120_p9 = scmp.lt.u32.totalorder %s116_s27, %s211_s1 }
  0x17   :  { %p122_p10 = pnand %p120_p9, %p117_p8 }
  0x19   :  { %125 = shalt.err (!%p122_p10)
}
  0x1a   :  { %s126_s4 = scalar_lea.vmem %s28_s24, 256  ;;  %p131_p12 = scmp.lt.s32.totalorder %s28_s24, %s28_s24 }
  0x1b   :  { %p127_p11 = scmp.ne.s32.totalorder %s28_s24, %s126_s4  ;;  %p132_p13 = scmp.lt.s32.totalorder %s126_s4, %s126_s4 }
  0x1d   :  { %p133_p0 = por %p132_p13, %p131_p12 }
  0x1f   :  { %p134_p1 = pnand %p133_p0, %p127_p11 }
  0x21   :  { %137 = shalt.err (!%p134_p1)
}
  0x22   :  { %33 = dma.hbm_to_vmem [thread:$0]  %s211_s1, 256, %s28_s24, [#allocation7], %s155_s19, %s155_s19, %s156_s20  }
  0x23   :  { %148 = dma.done.wait [#allocation4], 256  }
  0x24   :  { %149 = vsyncadd [#allocation4], 4294967040 }
  0x25   :  { %150 = dma.done.wait [#allocation7], 256  }
  0x26   :  { %151 = vsyncadd [#allocation7], 4294967040  ;;  %v45_v0 = vld [vmem:[#allocation3] sm:$0xff]  ;;  %v46_v1 = vld [vmem:[#allocation3 + $0x8] sm:$0xff]  ;;  %s138_s8 = scalar_lea.hbm %s212_s2, 16 }
  0x27   :  { %v47_v2 = vld [vmem:[#allocation6] sm:$0xff]  ;;  %v48_v3 = vld [vmem:[#allocation6 + $0x8] sm:$0xff]  ;;  %p139_p2 = scmp.ne.s32.totalorder %s212_s2, %s138_s8  ;;  %p142_p3 = scmp.lt.u32.totalorder %s138_s8, %s212_s2 }
  0x28   :  { %v49_v4 = vsub.f32 %v45_v0, %v47_v2  ;;  %v50_v5 = vsub.f32 %v46_v1, %v48_v3 }
  0x29   :  { %p144_p4 = pnand %p142_p3, %p139_p2 }
  0x2a   :  { %v52_v6 = vmul.f32 %v49_v4, %v49_v4  ;;  %v53_v7 = vmul.f32 %v50_v5, %v50_v5 }
  0x2c   :  { %v54_v8 = vadd.f32 %v53_v7, %v52_v6 }
  0x2e   :  { %61 = vadd.xlane.f32.xlu0 %v54_v8 }
  0xbb   :  { %v62_v9 = vpop.xlane.xlu0 %61 }
  0xbc   :  { %v63_v10 = vrot.slane %v62_v9, 4 }
  0xbe   :  { %v64_v11 = vadd.f32 %v63_v10, %v62_v9 }
  0xc0   :  { %v65_v12 = vrot.slane %v64_v11, 2 }
  0xc2   :  { %v66_v13 = vadd.f32 %v65_v12, %v64_v11 }
  0xc4   :  { %v67_v14 = vrot.slane %v66_v13, 1 }
  0xc6   :  { %v68_v15 = vadd.f32 %v67_v14, %v66_v13 }
  0xc8   :  { %87 = vpush %v68_v15 }
  0xf9   :  { %s88_s1 = spop %87 }
  0xfa   :  { %71 = sst [smem:[#allocation8]] %s88_s1 }
  0xfb   :  { %147 = shalt.err (!%p144_p4)
}
  0xfc   :  { %s158_s13 = smov [#allocation8]  }
  0xfd   :  { %79 = dma.smem_to_hbm %s158_s13, 16, %s212_s2, [#allocation5]  }
  0xfe   :  { %152 = dma.done.wait [#allocation5], 16  }
  0xff   :  { %153 = vsyncadd [#allocation5], 4294967280 }
 0x100   :  { %83 = sfence }
 0x101   :  { %84 = vsyncpa [#allocation4], 1 }
 0x102   :  { %85 = vsyncpa [#allocation7], 1 }
 0x103   :  { %86 = vsyncpa [#allocation5], 1 }

</bundles_post_ra>
